<compile_context>
chip_gen: v6e
topology: v6e:2x2x1
jax: 0.10.0
libtpu: 0.0.40
codegen_flags: <defaults>
</compile_context>

<pallas_src>
import functools

import jax
import jax.numpy as jnp
from jax.experimental import pallas as pl
from jax.experimental.pallas import tpu as pltpu


def _round_up(x, m):
    return (x + m - 1) // m * m


def _cdiv(a, b):
    return (a + b - 1) // b


def _vmem_capacity_bytes():
    """Per-core VMEM capacity; conservative 64 MiB (v7x) if the query fails."""
    try:
        return int(pltpu.get_tpu_info().vmem_capacity_bytes)
    except Exception:
        return 64 << 20


def _mxu_lane_width():
    """256-lane packing on v6e/v7x (256-wide MXU); 128 on v5e / unknown."""
    try:
        kind = jax.devices()[0].device_kind.lower()
    except Exception:
        return 128
    if ("v6" in kind) or ("v7" in kind) or ("tpu7" in kind):
        return 256
    return 128


def _embed_kernel(ids_ref, emb_ref, out_ref):
    """Unpacked path (D multiple of 128, or D that cannot be lane-packed).

    ids_ref: (TN, 1) int32   emb_ref: (V, D)   out_ref: (TN, D)
    """
    ids = ids_ref[...]                                       # (TN, 1)
    tn = ids.shape[0]
    v = emb_ref.shape[0]
    col = jax.lax.broadcasted_iota(jnp.int32, (tn, v), 1)    # (TN, V)
    one_hot = (ids == col).astype(emb_ref.dtype)             # (TN, V)
    out_ref[...] = jnp.dot(
        one_hot, emb_ref[...], preferred_element_type=jnp.float32
    ).astype(out_ref.dtype)


def _embed_packed_kernel(ids_ref, emb_ref, out_ref):
    """Lane-dense path for D < 128 with P = lane_width // D tokens per row.

    ids_ref: (TN/P, P) int32, column j already offset by j*V
    emb_ref: (P*V, P*D) block-diagonal table (kron(eye(P), table))
    out_ref: (TN/P, P*D) -- full 128/256-lane (unmasked) stores
    """
    ids = ids_ref[...]                                        # (TNp, P)
    tnp, p = ids.shape
    pv = emb_ref.shape[0]                                     # P * V
    col = jax.lax.broadcasted_iota(jnp.int32, (tnp, pv), 1)   # (TNp, P*V)
    # Boolean OR across the P compares, cast to the table dtype once at the
    # end (cheaper on the VALU than P f32 adds).
    hit = ids[:, 0:1] == col
    for j in range(1, p):                                     # static, tiny loop
        hit = jnp.logical_or(hit, ids[:, j:j + 1] == col)
    one_hot = hit.astype(emb_ref.dtype)
    out_ref[...] = jnp.dot(
        one_hot, emb_ref[...], preferred_element_type=jnp.float32
    ).astype(out_ref.dtype)


def _gather_row_kernel(ids_ref, row_ref, out_ref):
    """Large-vocab fallback: per-token row gather (table stays in HBM-ish).

    ids_ref: (N,) int32 scalar-prefetch (SMEM); row_ref/out_ref: (1, D).
    """
    del ids_ref
    out_ref[...] = row_ref[...].astype(out_ref.dtype)


@functools.partial(jax.jit, static_argnames=("token_block", "use_bf16_table"))
def word_embedding(ids, emb_table, *, token_block=None, use_bf16_table=False):
    """Pallas equivalent of `nn.Embedding(V, D)(ids)`.

    ids:       (B, S) int32
    emb_table: (V, D) float32
    returns:   (B, S, D) float32
    """
    b, s = ids.shape
    v, d = emb_table.shape
    n = b * s
    out_dtype = emb_table.dtype
    tbl_dtype = jnp.bfloat16 if use_bf16_table else emb_table.dtype
    tbl_itemsize = jnp.dtype(tbl_dtype).itemsize

    vmem_cap = _vmem_capacity_bytes()
    vmem_target = (3 * vmem_cap) // 4            # ~48 MiB v7x, ~96 MiB v5e/v6e
    lane = _mxu_lane_width()

    if token_block is None:
        # >= ~1 MiB of output per grid step (~85% of the f32 HBM roofline),
        # never fewer than 2048 tokens.
        token_block = max(2048, _cdiv(1 << 20, max(d, 1) * 4))
    token_block = max(int(token_block), 1)

    # ---- dispatch: big vocab -> DMA row gather (table never fits in VMEM) ----
    unpacked_tbl_bytes = _round_up(v, 8) * _round_up(d, 128) * tbl_itemsize
    use_gather = unpacked_tbl_bytes > vmem_target // 2

    # ---- lane-dense packing factor (D < 128) ----
    pack = 1
    if (not use_gather) and d % 128 != 0:
        for cand_lane in (lane, 128):            # prefer 256-lane rows on v6e/v7x
            if d < cand_lane and cand_lane % d == 0:
                cand = cand_lane // d
                packed_tbl_bytes = _round_up(cand * v, 8) * cand_lane * tbl_itemsize
                if packed_tbl_bytes <= vmem_target // 4:   # cap pack for big V
                    pack = cand
                    break

    lane_out = pack * d                           # 128/256 when packed, D when not
    row_align = 8 * pack                          # block rows stay multiples of 8
    n_pad = _round_up(n, pack)                    # minimal padding only

    tbl_rows = pack * v
    tbl_cols = lane_out if pack > 1 else _round_up(d, 128)
    tbl_resident_bytes = _round_up(tbl_rows, 8) * tbl_cols * tbl_itemsize
    # Single-buffer the constant table once it is big enough to matter.
    single_buffer_table = tbl_resident_bytes > (1 << 20)
    table_bufs = 1 if single_buffer_table else 2

    def vmem_budget(tb_tokens):
        rows = tb_tokens // pack
        k = _round_up(tbl_rows, 128)
        ids_bytes = 2 * rows * 128 * 4            # ids block, lane-padded, 2 bufs
        tbl_bytes = table_bufs * tbl_resident_bytes
        out_bytes = 2 * rows * _round_up(lane_out, 128) * 4
        onehot_bytes = 3 * rows * k * 4           # one-hot + iota/compare temps
        return ids_bytes + tbl_bytes + out_bytes + onehot_bytes

    tb = row_align
    if not use_gather:
        tb = _round_up(min(token_block, _round_up(n_pad, row_align)), row_align)
        while vmem_budget(tb) > vmem_target and tb > row_align:
            tb = max(row_align, _round_up(tb // 2, row_align))
        if vmem_budget(tb) > vmem_target:
            use_gather = True                     # fall back rather than VMEM-OOM
        elif n_pad >= 4 * row_align:
            # >= 2 grid steps when there is enough work so that v7x's two
            # TensorCores both get a share of the "parallel" grid axis.
            tb = min(tb, _round_up(_cdiv(n_pad, 2), row_align))

    # ---------------- large-vocab / fallback path: DMA row gather -------------
    if use_gather:
        # TODO(synk): batch multiple rows per grid step with a manual
        # make_async_copy gather to amortize the ~0.35us/step overhead.
        ids_flat = ids.reshape(n).astype(jnp.int32)
        out_flat = pl.pallas_call(
            _gather_row_kernel,
            out_shape=jax.ShapeDtypeStruct((n, d), out_dtype),
            grid_spec=pltpu.PrefetchScalarGridSpec(
                num_scalar_prefetch=1,
                grid=(n,),
                in_specs=[
                    pl.BlockSpec((pl.Element(1), d),
                                 lambda i, ids_ref: (ids_ref[i], 0)),
                ],
                out_specs=pl.BlockSpec((1, d), lambda i, ids_ref: (i, 0)),
            ),
            compiler_params=pltpu.CompilerParams(
                dimension_semantics=("arbitrary",),
                vmem_limit_bytes=int(32 << 20),
            ),
        )(ids_flat, emb_table)
        return out_flat.reshape(b, s, d)

    # ---------------- one-hot MXU path ----------------------------------------
    vmem_limit = int(min(max(vmem_budget(tb) + (8 << 20), 32 << 20), vmem_cap))
    cparams = pltpu.CompilerParams(
        dimension_semantics=("parallel",),        # megacore-shardable grid axis
        vmem_limit_bytes=vmem_limit,
    )
    tbl_spec_kwargs = (
        {"pipeline_mode": pl.Buffered(1)} if single_buffer_table else {}
    )
    grid = (_cdiv(n_pad // pack, tb // pack),)

    if pack > 1:
        # ids arranged (n_pad/P, P) with column j offset by j*V so one matmul
        # against the block-diagonal table emits packed 128/256-lane rows.
        # Padded ids (id 0) only fill the tail of the last packed row; the
        # ragged grid block's extra rows are masked on store by Pallas.
        ids_flat = ids.reshape(n).astype(jnp.int32)
        if n_pad != n:
            ids_flat = jnp.pad(ids_flat, (0, n_pad - n))
        ids_grp = ids_flat.reshape(n_pad // pack, pack) + (
            jnp.arange(pack, dtype=jnp.int32) * v)[None, :]
        # TODO(synk): for moderate V this (P*V, P*D) block-diagonal table should
        # be precomputed once by the caller instead of rebuilt (kron) per call.
        emb_bd = jnp.kron(jnp.eye(pack, dtype=tbl_dtype),
                          emb_table.astype(tbl_dtype))

        out_packed = pl.pallas_call(
            _embed_packed_kernel,
            out_shape=jax.ShapeDtypeStruct((n_pad // pack, lane_out), out_dtype),
            grid_spec=pltpu.PrefetchScalarGridSpec(
                num_scalar_prefetch=0,
                grid=grid,
                in_specs=[
                    pl.BlockSpec((tb // pack, pack), lambda i: (i, 0)),   # ids
                    pl.BlockSpec((pack * v, lane_out), lambda i: (0, 0),  # table
                                 **tbl_spec_kwargs),
                ],
                out_specs=pl.BlockSpec((tb // pack, lane_out), lambda i: (i, 0)),
            ),
            compiler_params=cparams,
        )(ids_grp, emb_bd)
        out_flat = out_packed.reshape(n_pad, d)   # zero-cost row-major view
        if n_pad != n:
            out_flat = out_flat[:n]
        return out_flat.reshape(b, s, d)

    # Unpacked path (pack == 1): no padding at all (n_pad == n), ragged last
    # grid block handled by Pallas masking.
    ids_2d = ids.reshape(n, 1).astype(jnp.int32)
    out_flat = pl.pallas_call(
        _embed_kernel,
        out_shape=jax.ShapeDtypeStruct((n, d), out_dtype),
        grid_spec=pltpu.PrefetchScalarGridSpec(
            num_scalar_prefetch=0,
            grid=grid,
            in_specs=[
                pl.BlockSpec((tb, 1), lambda i: (i, 0)),     # ids block
                pl.BlockSpec((v, d), lambda i: (0, 0),       # full table (resident)
                             **tbl_spec_kwargs),
            ],
            out_specs=pl.BlockSpec((tb, d), lambda i: (i, 0)),
        ),
        compiler_params=cparams,
    )(ids_2d, emb_table.astype(tbl_dtype))
    return out_flat.reshape(b, s, d)


if __name__ == "__main__":
    # Synthetic "config": ENG_VOCAB_SIZE=64, EMBED_DIM=32.
    VOCAB_SIZE = 64
    EMBED_DIM = 32

    key = jax.random.PRNGKey(0)
    k_emb, k_ids1, k_ids2, k_ids3 = jax.random.split(key, 4)

    # nn.Embedding default init: N(0, 1).
    emb_table = jax.random.normal(k_emb, (VOCAB_SIZE, EMBED_DIM), dtype=jnp.float32)

    # Small demo shape (single grid step, packed lane-dense path).
    ids_small = jax.random.randint(k_ids1, (2, 8), 0, VOCAB_SIZE, dtype=jnp.int32)
    out_small = jax.block_until_ready(word_embedding(ids_small, emb_table))
    ref_small = emb_table[ids_small]
    assert out_small.shape == (2, 8, EMBED_DIM), out_small.shape
    assert jnp.allclose(out_small, ref_small, atol=1e-5), "mismatch (small)"

    # Larger token count: multi-block grid (>= 2 steps) + ragged last block.
    ids_big = jax.random.randint(k_ids2, (4, 300), 0, VOCAB_SIZE, dtype=jnp.int32)
    out_big = jax.block_until_ready(word_embedding(ids_big, emb_table))
    ref_big = emb_table[ids_big]
    assert out_big.shape == (4, 300, EMBED_DIM), out_big.shape
    assert jnp.allclose(out_big, ref_big, atol=1e-5), "mismatch (big)"

    # Token count not a multiple of the packing factor (pad + trim path).
    ids_odd = jax.random.randint(k_ids3, (3, 7), 0, VOCAB_SIZE, dtype=jnp.int32)
    out_odd = jax.block_until_ready(word_embedding(ids_odd, emb_table))
    ref_odd = emb_table[ids_odd]
    assert out_odd.shape == (3, 7, EMBED_DIM), out_odd.shape
    assert jnp.allclose(out_odd, ref_odd, atol=1e-5), "mismatch (odd)"

    print("KERNEL_OK")
</pallas_src>

<mosaic_0001>
module attributes {stable_mosaic.version = 11 : i64} {
  func.func @_embed_packed_kernel(%arg0: i32, %arg1: memref<8x4xi32, #tpu.memory_space<vmem>>, %arg2: memref<256x128xf32, #tpu.memory_space<vmem>>, %arg3: memref<8x128xf32, #tpu.memory_space<vmem>>) attributes {dimension_semantics = [#tpu.dimension_semantics<parallel>], iteration_bounds = array<i64: 1>, scalar_prefetch = 0 : i64, scratch_operands = 0 : i64, tpu.core_type = #tpu.core_type<tc>, window_params = [{transform_indices = @transform_0, window_bounds = array<i64: 8, 4>}, {pipeline_mode = #tpu.pipeline_mode<synchronous>, transform_indices = @transform_1, window_bounds = array<i64: 256, 128>}, {transform_indices = @transform_2, window_bounds = array<i64: 8, 128>}]} {
    %c0 = arith.constant 0 : index
    %c0_0 = arith.constant 0 : index
    %0 = vector.load %arg1[%c0, %c0_0] : memref<8x4xi32, #tpu.memory_space<vmem>>, vector<8x4xi32>
    %1 = tpu.iota {dimensions = array<i32: 1>} : vector<8x256xi32>
    %2 = vector.extract_strided_slice %0 {offsets = [0, 0], sizes = [8, 1], strides = [1, 1]} : vector<8x4xi32> to vector<8x1xi32>
    %3 = vector.broadcast %2 : vector<8x1xi32> to vector<8x256xi32>
    %4 = arith.cmpi eq, %3, %1 : vector<8x256xi32>
    %5 = vector.extract_strided_slice %0 {offsets = [0, 1], sizes = [8, 1], strides = [1, 1]} : vector<8x4xi32> to vector<8x1xi32>
    %6 = vector.broadcast %5 : vector<8x1xi32> to vector<8x256xi32>
    %7 = arith.cmpi eq, %6, %1 : vector<8x256xi32>
    %8 = arith.ori %4, %7 : vector<8x256xi1>
    %9 = vector.extract_strided_slice %0 {offsets = [0, 2], sizes = [8, 1], strides = [1, 1]} : vector<8x4xi32> to vector<8x1xi32>
    %10 = vector.broadcast %9 : vector<8x1xi32> to vector<8x256xi32>
    %11 = arith.cmpi eq, %10, %1 : vector<8x256xi32>
    %12 = arith.ori %8, %11 : vector<8x256xi1>
    %13 = vector.extract_strided_slice %0 {offsets = [0, 3], sizes = [8, 1], strides = [1, 1]} : vector<8x4xi32> to vector<8x1xi32>
    %14 = vector.broadcast %13 : vector<8x1xi32> to vector<8x256xi32>
    %15 = arith.cmpi eq, %14, %1 : vector<8x256xi32>
    %16 = arith.ori %12, %15 : vector<8x256xi1>
    %17 = arith.extui %16 : vector<8x256xi1> to vector<8x256xi32>
    %18 = arith.sitofp %17 : vector<8x256xi32> to vector<8x256xf32>
    %c0_1 = arith.constant 0 : index
    %c0_2 = arith.constant 0 : index
    %19 = vector.load %arg2[%c0_1, %c0_2] : memref<256x128xf32, #tpu.memory_space<vmem>>, vector<256x128xf32>
    %cst = arith.constant dense<0.000000e+00> : vector<8x128xf32>
    %20 = tpu.matmul %18, %19, %cst {dimension_numbers = #tpu.dot_dimension_numbers<[1], [0], [0], [1], [0, 0, 1, 1], [], []>} : vector<8x256xf32>, vector<256x128xf32>, vector<8x128xf32> -> vector<8x128xf32>
    %c0_3 = arith.constant 0 : index
    %c0_4 = arith.constant 0 : index
    %21 = vector.load %arg3[%c0_3, %c0_4] : memref<8x128xf32, #tpu.memory_space<vmem>>, vector<8x128xf32>
    tpu.vector_store %arg3[%c0_3, %c0_4], %20 {strides = array<i32>} : memref<8x128xf32, #tpu.memory_space<vmem>>, vector<8x128xf32>,
    return
  }
  func.func @transform_0(%arg0: i32) -> (i32, i32) {
    %c0_i32 = arith.constant 0 : i32
    %c0_i32_0 = arith.constant 0 : i32
    return %arg0, %c0_i32 : i32, i32
  }
  func.func @transform_1(%arg0: i32) -> (i32, i32) {
    %c0_i32 = arith.constant 0 : i32
    %c0_i32_0 = arith.constant 0 : i32
    %c0_i32_1 = arith.constant 0 : i32
    return %c0_i32, %c0_i32_0 : i32, i32
  }
  func.func @transform_2(%arg0: i32) -> (i32, i32) {
    %c0_i32 = arith.constant 0 : i32
    %c0_i32_0 = arith.constant 0 : i32
    return %arg0, %c0_i32 : i32, i32
  }
}

</mosaic_0001>

<bundles_post_ra>
// kernel: word_embedding.1
= control target key start
LH: loop header
LB: loop body
LE: loop exit
PB: predicated region body
PF: predicated region fallthrough
CT: control target
= control target key end

     0   :  { %v238_v2 = vmov 0   ;;  %v239_v3 = vmov 2   ;;  %v240_v7 = vmov 1   ;;  %v241_v8 = vmov 3   ;;  %s360_s0 = inlined_call_operand.vmem [shape: s32[4,4], index: 0, kind: input, shape index: {}]   ;;  %s361_s1 = inlined_call_operand.vmem [shape: f32[256,128], index: 1, kind: input, shape index: {}]   ;;  %s362_s2 = inlined_call_operand.vmem [shape: f32[4,128], index: 2, kind: output, shape index: {}]  }
   0x1   :  { %v11_v0 = vld [vmem:[%s360_s0] sm:$0xff]  ;;  %v76_v1 = vld [vmem:[%s361_s1 + $0xf8] sm:$0xff]  ;;  %233 = vset.pattern.permute.xlu0 %v238_v2  ;;  %235 = vset.pattern.permute.xlu1 %v239_v3  ;;  %v75_v5 = vld [vmem:[%s361_s1 + $0xf0] sm:$0xff]  ;;  %v12_v37 = vlaneseq  ;;  %v242_v44 = vmov 1.0  }
   0x2   :  { %v60_v4 = vld [vmem:[%s361_s1 + $0x78] sm:$0xff]  ;;  %16 = vperm.xlu0 %233, %v11_v0   ;;  %28 = vperm.xlu1 %235, %v11_v0   ;;  %v59_v6 = vld [vmem:[%s361_s1 + $0x70] sm:$0xff]  ;;  %v74_v9 = vld [vmem:[%s361_s1 + $0xe8] sm:$0xff] }
   0x3   :  { %193 = vmatprep.subr.mxu0 %v76_v1  ;;  %v58_v10 = vld [vmem:[%s361_s1 + $0x68] sm:$0xff]  ;;  %v73_v11 = vld [vmem:[%s361_s1 + $0xe0] sm:$0xff]  ;;  %v72_v13 = vld [vmem:[%s361_s1 + $0xd8] sm:$0xff]  ;;  %v13_v38 = vand.u32 127, %v12_v37 }
   0x4   :  { %194 = vmatpush3.msra.mxu0 %v60_v4  ;;  %v57_v12 = vld [vmem:[%s361_s1 + $0x60] sm:$0xff]  ;;  %v56_v14 = vld [vmem:[%s361_s1 + $0x58] sm:$0xff]  ;;  %v71_v15 = vld [vmem:[%s361_s1 + $0xd0] sm:$0xff] }
   0x5   :  { %195 = vmatprep.subr.mxu0 %v75_v5  ;;  %v55_v16 = vld [vmem:[%s361_s1 + $0x50] sm:$0xff]  ;;  %v70_v17 = vld [vmem:[%s361_s1 + $0xc8] sm:$0xff]  ;;  %v69_v19 = vld [vmem:[%s361_s1 + $0xc0] sm:$0xff]  ;;  %v14_v41 = vadd.s32 128, %v13_v38 }
   0x6   :  { %234 = vset.pattern.permute.xlu0 %v240_v7  ;;  %236 = vset.pattern.permute.xlu1 %v241_v8  ;;  %v54_v18 = vld [vmem:[%s361_s1 + $0x48] sm:$0xff]  ;;  %v53_v20 = vld [vmem:[%s361_s1 + $0x40] sm:$0xff]  ;;  %v68_v21 = vld [vmem:[%s361_s1 + $0xb8] sm:$0xff] }
   0x7   :  { %21 = vperm.xlu0 %234, %v11_v0   ;;  %35 = vperm.xlu1 %236, %v11_v0   ;;  %v52_v22 = vld [vmem:[%s361_s1 + $0x38] sm:$0xff]  ;;  %v67_v23 = vld [vmem:[%s361_s1 + $0xb0] sm:$0xff]  ;;  %v66_v25 = vld [vmem:[%s361_s1 + $0xa8] sm:$0xff] }
   0x8   :  { %196 = vmatpush3.msra.mxu0 %v59_v6  ;;  %v51_v24 = vld [vmem:[%s361_s1 + $0x30] sm:$0xff]  ;;  %v50_v26 = vld [vmem:[%s361_s1 + $0x28] sm:$0xff]  ;;  %v65_v27 = vld [vmem:[%s361_s1 + $0xa0] sm:$0xff] }
   0x9   :  { %197 = vmatprep.subr.mxu0 %v74_v9  ;;  %v49_v28 = vld [vmem:[%s361_s1 + $0x20] sm:$0xff]  ;;  %v64_v29 = vld [vmem:[%s361_s1 + $0x98] sm:$0xff]  ;;  %v63_v31 = vld [vmem:[%s361_s1 + $0x90] sm:$0xff] }
   0xa   :  { %198 = vmatpush3.msra.mxu0 %v58_v10  ;;  %v48_v30 = vld [vmem:[%s361_s1 + $0x18] sm:$0xff]  ;;  %v47_v32 = vld [vmem:[%s361_s1 + $0x10] sm:$0xff]  ;;  %v62_v33 = vld [vmem:[%s361_s1 + $0x88] sm:$0xff] }
   0xb   :  { %199 = vmatprep.subr.mxu0 %v73_v11  ;;  %237 = vset.pattern.permute.xlu0 %v241_v8  ;;  %v46_v34 = vld [vmem:[%s361_s1 + $0x8] sm:$0xff]  ;;  %v61_v35 = vld [vmem:[%s361_s1 + $0x80] sm:$0xff] }
   0xc   :  { %200 = vmatpush3.msra.mxu0 %v57_v12  ;;  %v45_v36 = vld [vmem:[%s361_s1] sm:$0xff] }
   0xd   :  { %201 = vmatprep.subr.mxu0 %v72_v13 }
   0xe   :  { %202 = vmatpush3.msra.mxu0 %v56_v14 }
   0xf   :  { %203 = vmatprep.subr.mxu0 %v71_v15 }
  0x10   :  { %204 = vmatpush3.msra.mxu0 %v55_v16 }
  0x11   :  { %205 = vmatprep.subr.mxu0 %v70_v17 }
  0x12   :  { %206 = vmatpush3.msra.mxu0 %v54_v18 }
  0x13   :  { %207 = vmatprep.subr.mxu0 %v69_v19 }
  0x14   :  { %208 = vmatpush3.msra.mxu0 %v53_v20 }
  0x15   :  { %209 = vmatprep.subr.mxu0 %v68_v21 }
  0x16   :  { %210 = vmatpush3.msra.mxu0 %v52_v22 }
  0x17   :  { %211 = vmatprep.subr.mxu0 %v67_v23 }
  0x18   :  { %212 = vmatpush3.msra.mxu0 %v51_v24 }
  0x19   :  { %213 = vmatprep.subr.mxu0 %v66_v25 }
  0x1a   :  { %214 = vmatpush3.msra.mxu0 %v50_v26 }
  0x1b   :  { %215 = vmatprep.subr.mxu0 %v65_v27 }
  0x1c   :  { %216 = vmatpush3.msra.mxu0 %v49_v28 }
  0x1d   :  { %217 = vmatprep.subr.mxu0 %v64_v29 }
  0x1e   :  { %218 = vmatpush3.msra.mxu0 %v48_v30 }
  0x1f   :  { %219 = vmatprep.subr.mxu0 %v63_v31 }
  0x20   :  { %220 = vmatpush3.msra.mxu0 %v47_v32 }
  0x21   :  { %221 = vmatprep.subr.mxu0 %v62_v33 }
  0x22   :  { %222 = vmatpush3.msra.mxu0 %v46_v34 }
  0x23   :  { %223 = vmatprep.subr.mxu0 %v61_v35 }
  0x24   :  { %224 = vmatpush3.msra.mxu0 %v45_v36 }
  0x7d   :  { %v17_v39 = vpop.permute.xlu0 %16  ;;  %v29_v40 = vpop.permute.xlu1 %28 }
  0x7e   :  { %vm18_vm0 = vcmp.eq.s32.totalorder %v17_v39, %v13_v38  ;;  %vm19_vm3 = vcmp.eq.s32.totalorder %v17_v39, %v14_v41  ;;  %vm30_vm6 = vcmp.eq.s32.totalorder %v29_v40, %v13_v38  ;;  %vm31_vm10 = vcmp.eq.s32.totalorder %v29_v40, %v14_v41 }
  0x82   :  { %v22_v42 = vpop.permute.xlu0 %21  ;;  %v36_v43 = vpop.permute.xlu1 %35 }
  0x83   :  { %vm23_vm1 = vcmp.eq.s32.totalorder %v22_v42, %v13_v38  ;;  %vm24_vm2 = vcmp.eq.s32.totalorder %v22_v42, %v14_v41  ;;  %vm37_vm5 = vcmp.eq.s32.totalorder %v36_v43, %v13_v38  ;;  %vm38_vm9 = vcmp.eq.s32.totalorder %v36_v43, %v14_v41 }
  0x84   :  { %vm25_vm4 = vmor %vm18_vm0, %vm23_vm1 }
  0x85   :  { %vm26_vm7 = vmor %vm19_vm3, %vm24_vm2 }
  0x86   :  { %vm32_vm8 = vmor %vm25_vm4, %vm30_vm6 }
  0x87   :  { %vm39_vm11 = vmor %vm32_vm8, %vm37_vm5 }
  0x88   :  { %vm33_vm12 = vmor %vm26_vm7, %vm31_vm10 }
  0x89   :  { %vm40_vm13 = vmor %vm33_vm12, %vm38_vm9 }
  0x8a   :  { %191 = vmatprep.mubr.msk.f32.mxu0 %vm40_vm13, %v242_v44 }
  0x8b   :  { %192 = vmatmul.mubr.msk.f32.vlgmr.msra.gmra.mxu0 %vm39_vm11, %v242_v44 }
 0x14b   :  { %v225_v45 = vpop.f32.mrf.mxu0 }
 0x14d   :  { %v226_v46 = vpop.f32.mrf.mxu0 }
 0x14e   :  { %v227_v47 = vadd.f32 %v226_v46, %v225_v45 }
 0x150   :  { %147 = vst [vmem:[#allocation2] sm:$0xff] %v227_v47 }
 0x157   :  { %v166_v48 = vld [vmem:[#allocation2] sm:$0xf] }
 0x158   :  { %167 = vst [vmem:[%s362_s2] sm:$0xf] %v166_v48 }

</bundles_post_ra>
